<compile_context>
chip_gen: v7x
topology: tpu7x:2x2x1
jax: 0.10.0
libtpu: 0.0.40
codegen_flags: <defaults>
</compile_context>

<pallas_src>
import jax
import jax.numpy as jnp
from jax.experimental import pallas as pl
from jax.experimental.pallas import tpu as pltpu


def swish_kernel(x_ref, beta_ref, o_ref):
    x = x_ref[...]                      # (block_b, block_d), input dtype
    beta = beta_ref[...]                # (1, block_d) -> broadcasts over rows
    # Multiply in the input dtype (saves casts / vreg pressure for bf16);
    # only the transcendental is done in f32.
    z = (beta * x).astype(jnp.float32)
    # sigmoid(z) = 0.5 * tanh(0.5 * z) + 0.5 : single EUP op per element.
    sig = 0.5 * jnp.tanh(0.5 * z) + 0.5
    o_ref[...] = (x * sig.astype(x.dtype)).astype(o_ref.dtype)


def _chip_config():
    """Per-generation tile budget / VMEM limit / megacore preference."""
    kind = ""
    try:
        kind = jax.devices()[0].device_kind.lower()
    except Exception:
        pass
    if "v7" in kind:
        # 3.2 TB/s HBM: bigger tiles amortize the ~0.35us/step cost; 64 MiB
        # physical VMEM -> 4 live buffers x 6 MiB is comfortably under a
        # 48 MiB explicit limit. 2 TCs -> prefer >= 2 grid steps.
        return {"target_bytes": 6 << 20, "vmem_limit_bytes": 48 << 20,
                "prefer_two_steps": True}
    if "v5 lite" in kind or "v5e" in kind or "v5litepod" in kind:
        # 16 MiB scoped-VMEM default; ~820 GB/s HBM -> 2 MiB tiles are already
        # past the overhead knee. Do not scale up.
        return {"target_bytes": 2 << 20, "vmem_limit_bytes": None,
                "prefer_two_steps": False}
    # v6e and anything unrecognized.
    return {"target_bytes": 3 << 20, "vmem_limit_bytes": None,
            "prefer_two_steps": False}


def _row_align(itemsize: int) -> int:
    # Sublane packing: f32 -> 8, bf16 -> 16, int8/fp8 -> 32.
    return {4: 8, 2: 16, 1: 32}.get(itemsize, 8)


def _choose_blocks(B, D, itemsize, target_bytes, prefer_two_steps):
    """D must already be a multiple of 128. Returns (block_b, block_d)."""
    align = _row_align(itemsize)
    bytes_per_row = D * itemsize

    if align * bytes_per_row <= target_bytes:
        # Full-row blocks: contiguous DMAs, 1-D grid over B, resident beta.
        block_d = D
        rows = (target_bytes // bytes_per_row // align) * align
        rows = max(align, rows)
        block_b = B if rows >= B else rows
        if prefer_two_steps and B >= 2 * align and block_b >= B:
            # v7x: ensure at least 2 grid steps so both TensorCores get work.
            half = -(-B // 2)
            half = -(-half // align) * align
            block_b = min(block_b, half)
        return block_b, block_d

    # A single aligned row-slab exceeds the budget (very large D): tile the
    # feature dim in lane-dense multiples of 128.
    lanes = max(128, (target_bytes // (align * itemsize) // 128) * 128)
    return min(align, B), min(D, lanes)


def swish(x: jax.Array, beta: jax.Array) -> jax.Array:
    """x: (B, D), beta: (D,). Returns x * sigmoid(beta[None, :] * x)."""
    B, D = x.shape
    assert beta.shape == (D,)
    cfg = _chip_config()
    itemsize = jnp.dtype(x.dtype).itemsize

    # Lane-dense feature dim: pad to the next multiple of 128, slice back.
    Dp = 128 * pl.cdiv(D, 128)
    if Dp != D:
        x_in = jnp.pad(x, ((0, 0), (0, Dp - D)))
        beta_in = jnp.pad(beta, (0, Dp - D))
    else:
        x_in, beta_in = x, beta
    beta2d = beta_in.reshape(1, Dp)

    block_b, block_d = _choose_blocks(
        B, Dp, itemsize, cfg["target_bytes"], cfg["prefer_two_steps"])
    num_b = pl.cdiv(B, block_b)
    num_d = pl.cdiv(Dp, block_d)

    if block_d == Dp:
        # Collapsed 1-D grid over the batch dim; beta block is resident.
        grid = (num_b,)
        x_spec = pl.BlockSpec((block_b, Dp), lambda i: (i, 0))
        b_spec = pl.BlockSpec((1, Dp), lambda i: (0, 0))
        o_spec = pl.BlockSpec((block_b, Dp), lambda i: (i, 0))
    else:
        # D-tiles on the outer (slow) axis so the tiny beta block is only
        # re-fetched when the feature tile changes.
        grid = (num_d, num_b)
        x_spec = pl.BlockSpec((block_b, block_d), lambda j, i: (i, j))
        b_spec = pl.BlockSpec((1, block_d), lambda j, i: (0, j))
        o_spec = pl.BlockSpec((block_b, block_d), lambda j, i: (i, j))

    cp_kwargs = dict(dimension_semantics=("parallel",) * len(grid))
    if cfg["vmem_limit_bytes"] is not None:
        cp_kwargs["vmem_limit_bytes"] = cfg["vmem_limit_bytes"]

    out = pl.pallas_call(
        swish_kernel,
        out_shape=jax.ShapeDtypeStruct((B, Dp), x.dtype),
        grid_spec=pltpu.PrefetchScalarGridSpec(
            num_scalar_prefetch=0,
            grid=grid,
            in_specs=[x_spec, b_spec],
            out_specs=o_spec,
        ),
        compiler_params=pltpu.CompilerParams(**cp_kwargs),
        cost_estimate=pl.CostEstimate(
            flops=4 * B * Dp,
            transcendentals=B * Dp,
            bytes_accessed=(2 * B * Dp + Dp) * itemsize,
        ),
    )(x_in, beta2d)

    if Dp != D:
        out = out[:, :D]
    return out


if __name__ == "__main__":
    key = jax.random.PRNGKey(0)

    # Shapes consistent with the module: (batch, dim).
    B, D = 16, 128
    x = jax.random.normal(key, (B, D), dtype=jnp.float32)
    beta = jnp.ones((D,), dtype=jnp.float32)  # nn.Parameter(torch.ones((dim,)))
    out = jax.block_until_ready(swish(x, beta))
    ref = x * jax.nn.sigmoid(beta[None, :] * x)
    assert out.shape == (B, D)
    assert jnp.allclose(out, ref, atol=1e-5, rtol=1e-5)

    # Misaligned feature dim (padded lane-dense path) + non-trivial beta.
    k1, k2 = jax.random.split(key)
    B2, D2 = 24, 96
    x2 = jax.random.normal(k1, (B2, D2), dtype=jnp.float32)
    beta2 = 1.0 + 0.1 * jax.random.normal(k2, (D2,), dtype=jnp.float32)
    out2 = jax.block_until_ready(swish(x2, beta2))
    ref2 = x2 * jax.nn.sigmoid(beta2[None, :] * x2)
    assert out2.shape == (B2, D2)
    assert jnp.allclose(out2, ref2, atol=1e-5, rtol=1e-5)

    # bf16 path: native bf16 multiplies, f32 transcendental.
    B3, D3 = 32, 256
    x3 = jax.random.normal(k2, (B3, D3), dtype=jnp.bfloat16)
    beta3 = jnp.ones((D3,), dtype=jnp.bfloat16)
    out3 = jax.block_until_ready(swish(x3, beta3))
    xf = x3.astype(jnp.float32)
    ref3 = xf * jax.nn.sigmoid(xf)
    assert out3.shape == (B3, D3)
    assert jnp.allclose(out3.astype(jnp.float32), ref3, atol=5e-2, rtol=5e-2)

    print("KERNEL_OK")
</pallas_src>

<mosaic_0001>
module attributes {stable_mosaic.version = 11 : i64} {
  func.func @swish_kernel(%arg0: i32, %arg1: memref<16x128xf32, #tpu.memory_space<vmem>>, %arg2: memref<1x128xf32, #tpu.memory_space<vmem>>, %arg3: memref<16x128xf32, #tpu.memory_space<vmem>>) attributes {dimension_semantics = [#tpu.dimension_semantics<parallel>], iteration_bounds = array<i64: 1>, scalar_prefetch = 0 : i64, scratch_operands = 0 : i64, tpu.core_type = #tpu.core_type<tc>, window_params = [{transform_indices = @transform_0, window_bounds = array<i64: 16, 128>}, {pipeline_mode = #tpu.pipeline_mode<synchronous>, transform_indices = @transform_1, window_bounds = array<i64: 1, 128>}, {transform_indices = @transform_2, window_bounds = array<i64: 16, 128>}]} {
    %c0 = arith.constant 0 : index
    %c0_0 = arith.constant 0 : index
    %0 = vector.load %arg1[%c0, %c0_0] : memref<16x128xf32, #tpu.memory_space<vmem>>, vector<16x128xf32>
    %c0_1 = arith.constant 0 : index
    %c0_2 = arith.constant 0 : index
    %1 = vector.load %arg2[%c0_1, %c0_2] : memref<1x128xf32, #tpu.memory_space<vmem>>, vector<1x128xf32>
    %2 = vector.broadcast %1 : vector<1x128xf32> to vector<16x128xf32>
    %3 = arith.mulf %2, %0 : vector<16x128xf32>
    %cst = arith.constant 5.000000e-01 : f32
    %4 = vector.broadcast %cst : f32 to vector<16x128xf32>
    %5 = arith.mulf %4, %3 : vector<16x128xf32>
    %6 = math.tanh %5 : vector<16x128xf32>
    %cst_3 = arith.constant 5.000000e-01 : f32
    %7 = vector.broadcast %cst_3 : f32 to vector<16x128xf32>
    %8 = arith.mulf %7, %6 : vector<16x128xf32>
    %cst_4 = arith.constant 5.000000e-01 : f32
    %9 = vector.broadcast %cst_4 : f32 to vector<16x128xf32>
    %10 = arith.addf %8, %9 : vector<16x128xf32>
    %11 = arith.mulf %0, %10 : vector<16x128xf32>
    %c0_5 = arith.constant 0 : index
    %c0_6 = arith.constant 0 : index
    %12 = vector.load %arg3[%c0_5, %c0_6] : memref<16x128xf32, #tpu.memory_space<vmem>>, vector<16x128xf32>
    tpu.vector_store %arg3[%c0_5, %c0_6], %11 {strides = array<i32>} : memref<16x128xf32, #tpu.memory_space<vmem>>, vector<16x128xf32>,
    return
  }
  func.func @transform_0(%arg0: i32) -> (i32, i32) {
    %c0_i32 = arith.constant 0 : i32
    %c0_i32_0 = arith.constant 0 : i32
    return %arg0, %c0_i32 : i32, i32
  }
  func.func @transform_1(%arg0: i32) -> (i32, i32) {
    %c0_i32 = arith.constant 0 : i32
    %c0_i32_0 = arith.constant 0 : i32
    %c0_i32_1 = arith.constant 0 : i32
    return %c0_i32, %c0_i32_0 : i32, i32
  }
  func.func @transform_2(%arg0: i32) -> (i32, i32) {
    %c0_i32 = arith.constant 0 : i32
    %c0_i32_0 = arith.constant 0 : i32
    return %arg0, %c0_i32 : i32, i32
  }
}

</mosaic_0001>

<bundles_post_ra>
// kernel: tpu_custom_call.1
= control target key start
LH: loop header
LB: loop body
LE: loop exit
PB: predicated region body
PF: predicated region fallthrough
CT: control target
= control target key end

     0   :  { %7 = vsyncpa [#allocation3], 0  ;;  %s175_s0 = inlined_call_operand.hbm [shape: f32[16,128], index: 0, kind: input, shape index: {}]   ;;  %s176_s1 = inlined_call_operand.vmem [shape: f32[1,128], index: 1, kind: input, shape index: {}]   ;;  %s177_s2 = inlined_call_operand.hbm [shape: f32[16,128], index: 2, kind: output, shape index: {}]  }
   0x1   :  { %8 = vsyncpa [#allocation4], 0  ;;  %s123_s9 = smov [#allocation2]   ;;  %s75_s13 = scalar_lea.hbm %s175_s0, 256 }
   0x2   :  { %s14_s10 = sshll.u32 %s123_s9, 4  ;;  %p76_p0 = scmp.ne.s32.totalorder %s175_s0, %s75_s13  ;;  %s15_s10 = int_to_ptr.vmem [resolvable:$true] %s14_s10 }
   0x3   :  { %p79_p1 = scmp.lt.u32.totalorder %s75_s13, %s175_s0 }
   0x5   :  { %p81_p2 = pnand %p79_p1, %p76_p0 }
   0x7   :  { %84 = shalt.err (!%p81_p2)
}
   0x8   :  { %s85_s18 = scalar_lea.vmem %s15_s10, 256  ;;  %p90_p4 = scmp.lt.s32.totalorder %s15_s10, %s15_s10 }
   0x9   :  { %p86_p3 = scmp.ne.s32.totalorder %s15_s10, %s85_s18  ;;  %p91_p5 = scmp.lt.s32.totalorder %s85_s18, %s85_s18 }
   0xb   :  { %p92_p6 = por %p91_p5, %p90_p4 }
   0xd   :  { %p93_p7 = pnand %p92_p6, %p86_p3 }
   0xf   :  { %96 = shalt.err (!%p93_p7)
}
  0x10   :  { %s124_s19 = smov 128   ;;  %s125_s20 = smov 8  }
  0x11   :  { %20 = dma.hbm_to_vmem [thread:$0]  %s175_s0, 256, %s15_s10, [#allocation3], %s124_s19, %s124_s19, %s125_s20  }
  0x12   :  { %119 = dma.done.wait [#allocation3], 256  }
  0x13   :  { %120 = vsyncadd [#allocation3], 4294967040  ;;  %v26_v0 = vld [vmem:[#allocation2] sm:$0xff]  ;;  %v27_v2 = vld [vmem:[#allocation2 + $0x8] sm:$0xff]  ;;  %s126_s0 = smov [#allocation5]  }
  0x14   :  { %v66_v1 = vld [vmem:[%s176_s1] ss:$0 sm:$0xff]  ;;  %s54_s25 = sshll.u32 %s126_s0, 4  ;;  %s55_s25 = int_to_ptr.vmem [resolvable:$true] %s54_s25 }
  0x15   :  { %v35_v3 = vmul.f32 %v66_v1, %v26_v0  ;;  %v36_v4 = vmul.f32 %v66_v1, %v27_v2  ;;  %s97_s1 = scalar_lea.vmem %s55_s25, 256  ;;  %p102_p9 = scmp.lt.s32.totalorder %s55_s25, %s55_s25 }
  0x16   :  { %p98_p8 = scmp.ne.s32.totalorder %s55_s25, %s97_s1  ;;  %p103_p10 = scmp.lt.s32.totalorder %s97_s1, %s97_s1 }
  0x17   :  { %v37_v5 = vmul.f32 0.5, %v35_v3  ;;  %v38_v6 = vmul.f32 0.5, %v36_v4 }
  0x18   :  { %p104_p11 = por %p103_p10, %p102_p9 }
  0x19   :  { %71 = vtanh.f32 %v37_v5 }
  0x1a   :  { %73 = vtanh.f32 %v38_v6  ;;  %p105_p12 = pnand %p104_p11, %p98_p8 }
  0x23   :  { %v72_v7 = vpop.eup %71 }
  0x24   :  { %v74_v8 = vpop.eup %73  ;;  %v41_v9 = vmul.f32 0.5, %v72_v7 }
  0x25   :  { %v42_v10 = vmul.f32 0.5, %v74_v8 }
  0x26   :  { %v43_v11 = vadd.f32 0.5, %v41_v9 }
  0x27   :  { %v44_v12 = vadd.f32 0.5, %v42_v10 }
  0x28   :  { %v45_v13 = vmul.f32 %v43_v11, %v26_v0 }
  0x29   :  { %v46_v14 = vmul.f32 %v44_v12, %v27_v2 }
  0x2a   :  { %47 = vst [vmem:[#allocation5] sm:$0xff] %v45_v13 }
  0x2b   :  { %48 = vst [vmem:[#allocation5 + $0x8] sm:$0xff] %v46_v14 }
  0x2c   :  { %108 = shalt.err (!%p105_p12)
}
  0x2d   :  { %s109_s28 = scalar_lea.hbm %s177_s2, 256 }
  0x2e   :  { %p110_p13 = scmp.ne.s32.totalorder %s177_s2, %s109_s28  ;;  %p113_p0 = scmp.lt.u32.totalorder %s109_s28, %s177_s2 }
  0x30   :  { %p115_p1 = pnand %p113_p0, %p110_p13 }
  0x32   :  { %118 = shalt.err (!%p115_p1)
}
  0x33   :  { %60 = dma.vmem_to_hbm [thread:$0]  %s55_s25, 256, %s177_s2, [#allocation4], %s124_s19, %s124_s19, %s125_s20  }
  0x34   :  { %121 = dma.done.wait [#allocation4], 256  }
  0x35   :  { %122 = vsyncadd [#allocation4], 4294967040 }
  0x36   :  { %64 = vsyncpa [#allocation3], 1 }
  0x37   :  { %65 = vsyncpa [#allocation4], 1 }

</bundles_post_ra>
